<compile_context>
chip_gen: v7x
topology: tpu7x:2x2x1
jax: 0.10.0
libtpu: 0.0.40
codegen_flags: <defaults>
</compile_context>

<pallas_src>
import math

import jax
import jax.numpy as jnp
from jax.experimental import pallas as pl
from jax.experimental.pallas import tpu as pltpu

_VMEM_LIMIT = 32 * 1024 * 1024  # safe on v5e / v6e / v7x; tiles below use far less


def _round_up(x, m):
    return ((x + m - 1) // m) * m


# ----------------------------------------------------------------------------
# Kernel 1: global moments of x (sum, sum of squares) -- tiled row reduction
# into an SMEM scalar pair.
# ----------------------------------------------------------------------------
def _moments_kernel(x_ref, out_ref):
    i = pl.program_id(0)

    @pl.when(i == 0)
    def _():
        out_ref[0] = 0.0
        out_ref[1] = 0.0

    xv = x_ref[...].astype(jnp.float32)
    out_ref[0] += jnp.sum(xv)
    out_ref[1] += jnp.sum(xv * xv)


def moments(x_pad, block_rows):
    n_pad, f_in = x_pad.shape
    return pl.pallas_call(
        _moments_kernel,
        out_shape=jax.ShapeDtypeStruct((2,), jnp.float32),
        grid=(n_pad // block_rows,),
        in_specs=[pl.BlockSpec((block_rows, f_in), lambda i: (i, 0))],
        out_specs=pl.BlockSpec(memory_space=pltpu.MemorySpace.SMEM),
        compiler_params=pltpu.CompilerParams(
            dimension_semantics=("arbitrary",)),
    )(x_pad)


# ----------------------------------------------------------------------------
# Kernel 2: d^{-1/2} of (A + I), tiled row-sum reduction over column tiles.
# The self-loop contributes the "+1" used to initialize the accumulator, so no
# N x N identity / iota is ever built.
# ----------------------------------------------------------------------------
def _degree_kernel(adj_ref, dinv_ref, acc_ref):
    k = pl.program_id(1)

    @pl.when(k == 0)
    def _():
        acc_ref[...] = jnp.ones_like(acc_ref)  # self-loop degree contribution

    acc_ref[...] += jnp.sum(adj_ref[...].astype(jnp.float32), axis=1, keepdims=True)

    @pl.when(k == pl.num_programs(1) - 1)
    def _():
        dinv_ref[...] = jax.lax.rsqrt(jnp.maximum(acc_ref[...], 1e-12))


def degree_inv_sqrt(adj_pad, block):
    n_pad = adj_pad.shape[0]
    grid = (n_pad // block, n_pad // block)
    return pl.pallas_call(
        _degree_kernel,
        out_shape=jax.ShapeDtypeStruct((n_pad, 1), jnp.float32),
        grid=grid,
        in_specs=[pl.BlockSpec((block, block), lambda i, k: (i, k))],
        out_specs=pl.BlockSpec((block, 1), lambda i, k: (i, 0)),
        scratch_shapes=[pltpu.VMEM((block, 1), jnp.float32)],
        compiler_params=pltpu.CompilerParams(
            dimension_semantics=("parallel", "arbitrary"),
            vmem_limit_bytes=_VMEM_LIMIT),
    )(adj_pad)


# ----------------------------------------------------------------------------
# Kernel 3: standardize x, support = x_std @ W, and fold the column-side
# D^{-1/2} of the symmetric normalization into the support rows.
# Stored bf16 (MXU-native input for the big propagation matmul).
# ----------------------------------------------------------------------------
def _support_kernel(stats_ref, x_ref, w_ref, dinv_ref, s_ref):
    mean = stats_ref[0]
    inv_std = stats_ref[1]
    x_std = (x_ref[...].astype(jnp.float32) - mean) * inv_std
    sup = jnp.dot(x_std, w_ref[...], preferred_element_type=jnp.float32)
    s_ref[...] = (sup * dinv_ref[...]).astype(s_ref.dtype)


def scaled_support(x_pad, w_pad, dinv, stats, block_rows):
    n_pad, f_in = x_pad.shape
    c_pad = w_pad.shape[1]
    return pl.pallas_call(
        _support_kernel,
        out_shape=jax.ShapeDtypeStruct((n_pad, c_pad), jnp.bfloat16),
        grid=(n_pad // block_rows,),
        in_specs=[
            pl.BlockSpec(memory_space=pltpu.MemorySpace.SMEM),   # [mean, 1/std]
            pl.BlockSpec((block_rows, f_in), lambda i: (i, 0)),  # x row tile
            pl.BlockSpec((f_in, c_pad), lambda i: (0, 0)),       # W (resident)
            pl.BlockSpec((block_rows, 1), lambda i: (i, 0)),     # d^{-1/2} rows
        ],
        out_specs=pl.BlockSpec((block_rows, c_pad), lambda i: (i, 0)),
        compiler_params=pltpu.CompilerParams(
            dimension_semantics=("parallel",)),
    )(stats, x_pad, w_pad, dinv)


# ----------------------------------------------------------------------------
# Kernel 4: out = D^{-1/2} (A + I) D^{-1/2} support
#   acc(i)  = sum_k A[i,k] @ S'[k]             (bf16 MXU inputs, f32 accumulate)
#   out(i)  = (acc(i) + S'[i]) * d^{-1/2}[i]   (self-loop term + row scale)
# Normalized adjacency is never materialized.
# ----------------------------------------------------------------------------
def _propagate_kernel(adj_ref, s_ref, s_diag_ref, dinv_ref, out_ref, acc_ref):
    k = pl.program_id(1)

    @pl.when(k == 0)
    def _():
        acc_ref[...] = jnp.zeros_like(acc_ref)

    acc_ref[...] += jnp.dot(adj_ref[...], s_ref[...],
                            preferred_element_type=jnp.float32)

    @pl.when(k == pl.num_programs(1) - 1)
    def _():
        out = (acc_ref[...] + s_diag_ref[...].astype(jnp.float32)) * dinv_ref[...]
        out_ref[...] = out.astype(out_ref.dtype)


def propagate(adj_pad, s_scaled, dinv, block):
    n_pad = adj_pad.shape[0]
    c_pad = s_scaled.shape[1]
    grid = (n_pad // block, n_pad // block)
    return pl.pallas_call(
        _propagate_kernel,
        out_shape=jax.ShapeDtypeStruct((n_pad, c_pad), jnp.float32),
        grid=grid,
        in_specs=[
            pl.BlockSpec((block, block), lambda i, k: (i, k)),   # A tile (bf16)
            pl.BlockSpec((block, c_pad), lambda i, k: (k, 0)),   # S' reduction tile
            pl.BlockSpec((block, c_pad), lambda i, k: (i, 0)),   # S' row tile (self loop)
            pl.BlockSpec((block, 1), lambda i, k: (i, 0)),       # d^{-1/2} rows
        ],
        out_specs=pl.BlockSpec((block, c_pad), lambda i, k: (i, 0)),
        scratch_shapes=[pltpu.VMEM((block, c_pad), jnp.float32)],
        compiler_params=pltpu.CompilerParams(
            dimension_semantics=("parallel", "arbitrary"),
            vmem_limit_bytes=_VMEM_LIMIT),
    )(adj_pad, s_scaled, s_scaled, dinv)


# ----------------------------------------------------------------------------
# Forward pass
# ----------------------------------------------------------------------------
def gcn_conv_forward(x, adjacency, weight):
    # TODO(synk): add_self_loops / normalize_laplacian_sparse are not defined in
    # the reference source; standard GCN normalization D^{-1/2}(A+I)D^{-1/2} with
    # D = rowsum(A+I) is assumed.  torch.sparse.mm is implemented as a dense
    # tiled matmul (no sparse format on the TPU path here).
    n, f_in = x.shape
    c_out = weight.shape[1]

    block = min(512, _round_up(n, 128))          # adjacency tile, multiple of 128
    n_pad = _round_up(n, block)
    c_pad = _round_up(c_out, 128)                # lane-dense outputs / full MXU cols

    x_pad = jnp.zeros((n_pad, f_in), jnp.float32).at[:n, :].set(x.astype(jnp.float32))
    # bf16 adjacency: exact for 0/1 entries, halves the dominant N*N HBM traffic.
    adj_pad = jnp.zeros((n_pad, n_pad), jnp.bfloat16).at[:n, :n].set(
        adjacency.astype(jnp.bfloat16))
    w_pad = jnp.zeros((f_in, c_pad), jnp.float32).at[:, :c_out].set(
        weight.astype(jnp.float32))

    # 1) global mean / unbiased std of x (moments in Pallas; 2-scalar finish here)
    sums = moments(x_pad, block)
    count = float(n * f_in)
    mean = sums[0] / count
    var = (sums[1] - sums[0] * mean) / (count - 1.0)       # unbiased, like torch.std()
    stats = jnp.stack([mean, jax.lax.rsqrt(jnp.maximum(var, 1e-12))]).astype(jnp.float32)

    # 2) d^{-1/2} of (A + I)
    dinv = degree_inv_sqrt(adj_pad, block)

    # 3) support = x_std @ W, pre-scaled by the column-side d^{-1/2}, stored bf16
    s_scaled = scaled_support(x_pad, w_pad, dinv, stats, block)

    # 4) out = D^{-1/2} (A + I) D^{-1/2} support
    out_pad = propagate(adj_pad, s_scaled, dinv, block)
    return out_pad[:n, :c_out]


def xavier_uniform(key, in_channels, out_channels):
    bound = math.sqrt(6.0 / (in_channels + out_channels))
    return jax.random.uniform(key, (in_channels, out_channels), jnp.float32,
                              -bound, bound)


if __name__ == "__main__":
    N = 16
    IN_CHANNELS = 8
    OUT_CHANNELS = 32

    key = jax.random.PRNGKey(0)
    k_x, k_a, k_w = jax.random.split(key, 3)

    x = jax.random.normal(k_x, (N, IN_CHANNELS), jnp.float32)
    a = (jax.random.uniform(k_a, (N, N)) < 0.3).astype(jnp.float32)
    adjacency = jnp.maximum(a, a.T) * (1.0 - jnp.eye(N, dtype=jnp.float32))
    weight = xavier_uniform(k_w, IN_CHANNELS, OUT_CHANNELS)

    out = gcn_conv_forward(x, adjacency, weight)
    out = jax.block_until_ready(out)

    # pure-JAX reference (f32) to sanity-check the bf16-input Pallas path
    x_std = (x - jnp.mean(x)) / jnp.std(x, ddof=1)
    support = x_std @ weight
    a_hat = adjacency + jnp.eye(N, dtype=jnp.float32)
    dis = 1.0 / jnp.sqrt(jnp.sum(a_hat, axis=1))
    ref = (dis[:, None] * a_hat * dis[None, :]) @ support

    assert out.shape == (N, OUT_CHANNELS)
    assert bool(jnp.all(jnp.isfinite(out)))
    assert bool(jnp.allclose(out, ref, atol=5e-2, rtol=5e-2))
    print("KERNEL_OK")
</pallas_src>

<mosaic_0001>
module attributes {stable_mosaic.version = 11 : i64} {
  func.func @_moments_kernel(%arg0: i32, %arg1: memref<128x8xf32, #tpu.memory_space<vmem>>, %arg2: memref<2xf32, #tpu.memory_space<smem>>) attributes {dimension_semantics = [#tpu.dimension_semantics<arbitrary>], iteration_bounds = array<i64: 1>, scalar_prefetch = 0 : i64, scratch_operands = 0 : i64, tpu.core_type = #tpu.core_type<tc>, window_params = [{transform_indices = @transform_0, window_bounds = array<i64: 128, 8>}, {transform_indices = @transform_1, window_bounds = array<i64: 2>}]} {
    %c0_i32 = arith.constant 0 : i32
    %0 = arith.cmpi eq, %arg0, %c0_i32 : i32
    %1 = arith.extui %0 : i1 to i32
    %c0_i32_0 = arith.constant 0 : i32
    %2 = arith.cmpi ne, %1, %c0_i32_0 : i32
    scf.if %2 {
      %cst_6 = arith.constant 0.000000e+00 : f32
      %c0_7 = arith.constant 0 : index
      %19 = memref.load %arg2[%c0_7] : memref<2xf32, #tpu.memory_space<smem>>
      memref.store %cst_6, %arg2[%c0_7] : memref<2xf32, #tpu.memory_space<smem>>
      %cst_8 = arith.constant 0.000000e+00 : f32
      %c1_9 = arith.constant 1 : index
      %20 = memref.load %arg2[%c1_9] : memref<2xf32, #tpu.memory_space<smem>>
      memref.store %cst_8, %arg2[%c1_9] : memref<2xf32, #tpu.memory_space<smem>>
    } else {
    }
    %c0 = arith.constant 0 : index
    %c0_1 = arith.constant 0 : index
    %3 = vector.load %arg1[%c0, %c0_1] : memref<128x8xf32, #tpu.memory_space<vmem>>, vector<128x8xf32>
    %c0_2 = arith.constant 0 : index
    %4 = memref.load %arg2[%c0_2] : memref<2xf32, #tpu.memory_space<smem>>
    %5 = vector.shape_cast %3 : vector<128x8xf32> to vector<1x128x8xf32>
    %cst = arith.constant dense<0.000000e+00> : vector<1xf32>
    %6 = vector.multi_reduction <add>, %5, %cst [1, 2] : vector<1x128x8xf32> to vector<1xf32>
    %7 = vector.shape_cast %6 : vector<1xf32> to vector<1x1x1xf32>
    %8 = vector.extract %7[0, 0, 0] : f32 from vector<1x1x1xf32>
    %9 = arith.addf %4, %8 : f32
    %c0_3 = arith.constant 0 : index
    %10 = memref.load %arg2[%c0_3] : memref<2xf32, #tpu.memory_space<smem>>
    memref.store %9, %arg2[%c0_3] : memref<2xf32, #tpu.memory_space<smem>>
    %c1 = arith.constant 1 : index
    %11 = memref.load %arg2[%c1] : memref<2xf32, #tpu.memory_space<smem>>
    %12 = arith.mulf %3, %3 : vector<128x8xf32>
    %13 = vector.shape_cast %12 : vector<128x8xf32> to vector<1x128x8xf32>
    %cst_4 = arith.constant dense<0.000000e+00> : vector<1xf32>
    %14 = vector.multi_reduction <add>, %13, %cst_4 [1, 2] : vector<1x128x8xf32> to vector<1xf32>
    %15 = vector.shape_cast %14 : vector<1xf32> to vector<1x1x1xf32>
    %16 = vector.extract %15[0, 0, 0] : f32 from vector<1x1x1xf32>
    %17 = arith.addf %11, %16 : f32
    %c1_5 = arith.constant 1 : index
    %18 = memref.load %arg2[%c1_5] : memref<2xf32, #tpu.memory_space<smem>>
    memref.store %17, %arg2[%c1_5] : memref<2xf32, #tpu.memory_space<smem>>
    return
  }
  func.func @transform_0(%arg0: i32) -> (i32, i32) {
    %c0_i32 = arith.constant 0 : i32
    %c0_i32_0 = arith.constant 0 : i32
    return %arg0, %c0_i32 : i32, i32
  }
  func.func @transform_1(%arg0: i32) -> i32 {
    %c0_i32 = arith.constant 0 : i32
    %c0_i32_0 = arith.constant 0 : i32
    return %c0_i32 : i32
  }
}

</mosaic_0001>

<bundles_post_ra>
// kernel: tpu_custom_call.1
= control target key start
LH: loop header
LB: loop body
LE: loop exit
PB: predicated region body
PF: predicated region fallthrough
CT: control target
= control target key end

     0   :  { %vm34_vm0 = vcmask 64512   ;;  %s273_s0 = inlined_call_operand.vmem [shape: f32[128,8], index: 0, kind: input, shape index: {}]   ;;  %s274_s1 = inlined_call_operand.hbm [shape: f32[2], index: 1, kind: output, shape index: {}]  }
   0x1   :  { %v17_v0 = vld [vmem:[%s273_s0] sm:$0xff]  ;;  %v18_v1 = vld [vmem:[%s273_s0 + $0x8] sm:$0xff]  ;;  %v19_v2 = vld [vmem:[%s273_s0 + $0x10] sm:$0xff] }
   0x2   :  { %v20_v3 = vld [vmem:[%s273_s0 + $0x18] sm:$0xff]  ;;  %v35_v4 = vsel %vm34_vm0, %v17_v0, 0.0  ;;  %v36_v5 = vsel %vm34_vm0, %v18_v1, 0.0  ;;  %v38_v6 = vsel %vm34_vm0, %v19_v2, 0.0  ;;  %v21_v7 = vld [vmem:[%s273_s0 + $0x20] sm:$0xff]  ;;  %v22_v10 = vld [vmem:[%s273_s0 + $0x28] sm:$0xff] }
   0x3   :  { %v37_v8 = vadd.f32 %v36_v5, %v35_v4  ;;  %v40_v9 = vsel %vm34_vm0, %v20_v3, 0.0  ;;  %v42_v12 = vsel %vm34_vm0, %v21_v7, 0.0 }
   0x5   :  { %v39_v11 = vadd.f32 %v38_v6, %v37_v8 }
   0x6   :  { %6 = vsyncpa [#allocation3], 0  ;;  %v23_v13 = vld [vmem:[%s273_s0 + $0x30] sm:$0xff]  ;;  %v79_v15 = vmul.f32 %v17_v0, %v17_v0  ;;  %v80_v16 = vmul.f32 %v18_v1, %v18_v1  ;;  %v81_v17 = vmul.f32 %v19_v2, %v19_v2  ;;  %v44_v18 = vsel %vm34_vm0, %v22_v10, 0.0  ;;  %v24_v19 = vld [vmem:[%s273_s0 + $0x38] sm:$0xff]  ;;  %s158_s12 = scalar_lea.hbm %s274_s1, 16 }
   0x7   :  { %v41_v14 = vadd.f32 %v40_v9, %v39_v11  ;;  %v82_v21 = vmul.f32 %v20_v3, %v20_v3  ;;  %v46_v22 = vsel %vm34_vm0, %v23_v13, 0.0  ;;  %v83_v23 = vmul.f32 %v21_v7, %v21_v7  ;;  %v25_v24 = vld [vmem:[%s273_s0 + $0x40] sm:$0xff]  ;;  %v26_v31 = vld [vmem:[%s273_s0 + $0x48] sm:$0xff]  ;;  %v27_v37 = vld [vmem:[%s273_s0 + $0x50] sm:$0xff]  ;;  %p159_p0 = scmp.ne.s32.totalorder %s274_s1, %s158_s12  ;;  %p162_p1 = scmp.lt.u32.totalorder %s158_s12, %s274_s1 }
   0x8   :  { %v95_v26 = vsel %vm34_vm0, %v79_v15, 0.0  ;;  %v96_v27 = vsel %vm34_vm0, %v80_v16, 0.0  ;;  %v98_v28 = vsel %vm34_vm0, %v81_v17, 0.0  ;;  %v48_v29 = vsel %vm34_vm0, %v24_v19, 0.0  ;;  %v28_v43 = vld [vmem:[%s273_s0 + $0x58] sm:$0xff]  ;;  %v29_v49 = vld [vmem:[%s273_s0 + $0x60] sm:$0xff] }
   0x9   :  { %v43_v20 = vadd.f32 %v42_v12, %v41_v14  ;;  %v97_v30 = vadd.f32 %v96_v27, %v95_v26  ;;  %v84_v33 = vmul.f32 %v22_v10, %v22_v10  ;;  %v100_v34 = vsel %vm34_vm0, %v82_v21, 0.0  ;;  %v30_v55 = vld [vmem:[%s273_s0 + $0x68] sm:$0xff]  ;;  %v31_v61 = vld [vmem:[%s273_s0 + $0x70] sm:$0xff]  ;;  %v32_v3 = vld [vmem:[%s273_s0 + $0x78] sm:$0xff]  ;;  %p164_p2 = pnand %p162_p1, %p159_p0 }
   0xa   :  { %v50_v35 = vsel %vm34_vm0, %v25_v24, 0.0  ;;  %v85_v39 = vmul.f32 %v23_v13, %v23_v13  ;;  %v102_v40 = vsel %vm34_vm0, %v83_v23, 0.0  ;;  %v52_v41 = vsel %vm34_vm0, %v26_v31, 0.0 }
   0xb   :  { %v45_v25 = vadd.f32 %v44_v18, %v43_v20  ;;  %v99_v36 = vadd.f32 %v98_v28, %v97_v30  ;;  %v86_v45 = vmul.f32 %v24_v19, %v24_v19  ;;  %v104_v46 = vsel %vm34_vm0, %v84_v33, 0.0 }
   0xc   :  { %v54_v47 = vsel %vm34_vm0, %v27_v37, 0.0  ;;  %v87_v51 = vmul.f32 %v25_v24, %v25_v24  ;;  %v106_v52 = vsel %vm34_vm0, %v85_v39, 0.0  ;;  %v56_v53 = vsel %vm34_vm0, %v28_v43, 0.0 }
   0xd   :  { %v47_v32 = vadd.f32 %v46_v22, %v45_v25  ;;  %v101_v42 = vadd.f32 %v100_v34, %v99_v36  ;;  %v88_v57 = vmul.f32 %v26_v31, %v26_v31  ;;  %v108_v58 = vsel %vm34_vm0, %v86_v45, 0.0 }
   0xe   :  { %v58_v59 = vsel %vm34_vm0, %v29_v49, 0.0  ;;  %v89_v63 = vmul.f32 %v27_v37, %v27_v37  ;;  %v110_v0 = vsel %vm34_vm0, %v87_v51, 0.0  ;;  %v60_v1 = vsel %vm34_vm0, %v30_v55, 0.0 }
   0xf   :  { %v49_v38 = vadd.f32 %v48_v29, %v47_v32  ;;  %v103_v48 = vadd.f32 %v102_v40, %v101_v42  ;;  %v90_v5 = vmul.f32 %v28_v43, %v28_v43  ;;  %v112_v6 = vsel %vm34_vm0, %v88_v57, 0.0 }
  0x10   :  { %v62_v7 = vsel %vm34_vm0, %v31_v61, 0.0  ;;  %v91_v10 = vmul.f32 %v29_v49, %v29_v49  ;;  %v114_v11 = vsel %vm34_vm0, %v89_v63, 0.0  ;;  %v64_v12 = vsel %vm34_vm0, %v32_v3, 0.0 }
  0x11   :  { %v51_v44 = vadd.f32 %v50_v35, %v49_v38  ;;  %v105_v54 = vadd.f32 %v104_v46, %v103_v48  ;;  %v92_v15 = vmul.f32 %v30_v55, %v30_v55  ;;  %v116_v16 = vsel %vm34_vm0, %v90_v5, 0.0 }
  0x12   :  { %v93_v19 = vmul.f32 %v31_v61, %v31_v61  ;;  %v118_v20 = vsel %vm34_vm0, %v91_v10, 0.0  ;;  %v94_v22 = vmul.f32 %v32_v3, %v32_v3 }
  0x13   :  { %v53_v50 = vadd.f32 %v52_v41, %v51_v44  ;;  %v107_v60 = vadd.f32 %v106_v52, %v105_v54  ;;  %v120_v23 = vsel %vm34_vm0, %v92_v15, 0.0 }
  0x14   :  { %v122_v25 = vsel %vm34_vm0, %v93_v19, 0.0  ;;  %v124_v27 = vsel %vm34_vm0, %v94_v22, 0.0 }
  0x15   :  { %v55_v56 = vadd.f32 %v54_v47, %v53_v50  ;;  %v109_v2 = vadd.f32 %v108_v58, %v107_v60 }
  0x17   :  { %v57_v62 = vadd.f32 %v56_v53, %v55_v56  ;;  %v111_v8 = vadd.f32 %v110_v0, %v109_v2 }
  0x19   :  { %v59_v4 = vadd.f32 %v58_v59, %v57_v62  ;;  %v113_v13 = vadd.f32 %v112_v6, %v111_v8 }
  0x1b   :  { %v61_v9 = vadd.f32 %v60_v1, %v59_v4  ;;  %v115_v17 = vadd.f32 %v114_v11, %v113_v13 }
  0x1d   :  { %v63_v14 = vadd.f32 %v62_v7, %v61_v9  ;;  %v117_v21 = vadd.f32 %v116_v16, %v115_v17 }
  0x1f   :  { %v65_v18 = vadd.f32 %v64_v12, %v63_v14  ;;  %v119_v24 = vadd.f32 %v118_v20, %v117_v21 }
  0x21   :  { %66 = vadd.xlane.f32.xlu0 %v65_v18  ;;  %v121_v26 = vadd.f32 %v120_v23, %v119_v24 }
  0x23   :  { %v123_v28 = vadd.f32 %v122_v25, %v121_v26 }
  0x25   :  { %v125_v29 = vadd.f32 %v124_v27, %v123_v28 }
  0x27   :  { %126 = vadd.xlane.f32.xlu0 %v125_v29 }
  0xae   :  { %v67_v30 = vpop.xlane.xlu0 %66 }
  0xaf   :  { %v68_v31 = vrot.slane %v67_v30, 4 }
  0xb1   :  { %v69_v32 = vadd.f32 %v68_v31, %v67_v30 }
  0xb3   :  { %v70_v33 = vrot.slane %v69_v32, 2 }
  0xb4   :  { %v127_v35 = vpop.xlane.xlu0 %126 }
  0xb5   :  { %v71_v34 = vadd.f32 %v70_v33, %v69_v32  ;;  %v128_v37 = vrot.slane %v127_v35, 4 }
  0xb7   :  { %v72_v36 = vrot.slane %v71_v34, 1  ;;  %v129_v39 = vadd.f32 %v128_v37, %v127_v35 }
  0xb9   :  { %v73_v38 = vadd.f32 %v72_v36, %v71_v34  ;;  %v130_v40 = vrot.slane %v129_v39, 2 }
  0xbb   :  { %152 = vpush %v73_v38  ;;  %v131_v41 = vadd.f32 %v130_v40, %v129_v39 }
  0xbd   :  { %v132_v42 = vrot.slane %v131_v41, 1 }
  0xbf   :  { %v133_v43 = vadd.f32 %v132_v42, %v131_v41 }
  0xc1   :  { %154 = vpush %v133_v43 }
  0xec   :  { %s153_s0 = spop %152 }
  0xed   :  { %77 = sst [smem:[#allocation2]] %s153_s0 }
  0xf2   :  { %s155_s9 = spop %154 }
  0xf3   :  { %137 = sst [smem:[#allocation2 + $0x1]] %s155_s9 }
  0xf4   :  { %167 = shalt.err (!%p164_p2)
}
  0xf5   :  { %s170_s17 = smov [#allocation2]  }
  0xf6   :  { %145 = dma.smem_to_hbm %s170_s17, 16, %s274_s1, [#allocation3]  }
  0xf7   :  { %168 = dma.done.wait [#allocation3], 16  }
  0xf8   :  { %169 = vsyncadd [#allocation3], 4294967280 }
  0xf9   :  { %149 = sfence }
  0xfa   :  { %150 = vsyncpa [#allocation3], 1 }

</bundles_post_ra>
